<compile_context>
chip_gen: v7x
topology: tpu7x:2x2x1
jax: 0.10.0
libtpu: 0.0.40
codegen_flags: <defaults>
</compile_context>

<pallas_src>
import functools

import jax
import jax.numpy as jnp
import numpy as np
from jax.experimental import pallas as pl
from jax.experimental.pallas import tpu as pltpu


# ----------------------------------------------------------------------------- rope tables
def rope_tables(rope_hw, rope_dim_half=32, theta=10000.0):
    """Replicates VisionRotaryEmbeddingFast(dim=64//2, pt_seq_len=rope_hw, ft_seq_len=rope_hw)."""
    d = rope_dim_half
    freqs = 1.0 / (theta ** (jnp.arange(0, d, 2)[: d // 2].astype(jnp.float32) / d))  # (d//2,)
    t = jnp.arange(rope_hw).astype(jnp.float32) / rope_hw * rope_hw                    # (hw,)
    f = t[:, None] * freqs[None, :]                                                    # (hw, d//2)
    f = jnp.repeat(f, 2, axis=-1)                                                      # (hw, d)
    hw, dd = rope_hw, f.shape[-1]
    f2 = jnp.concatenate(
        [jnp.broadcast_to(f[:, None, :], (hw, hw, dd)),
         jnp.broadcast_to(f[None, :, :], (hw, hw, dd))], axis=-1)                      # (hw, hw, 2d)
    cos = jnp.cos(f2).reshape(hw * hw, 2 * dd)
    sin = jnp.sin(f2).reshape(hw * hw, 2 * dd)
    return cos, sin  # (hw*hw, 64)


# ----------------------------------------------------------------------------- kernel
def _attention_kernel(num_heads, head_dim,
                      x_ref, val_ref, wq_ref, wkv_ref,
                      cos_ref, sina_ref, sinb_ref, ln_g_ref, ln_b_ref,
                      wp_ref, bp_ref, out_ref, o_scratch):
    AH = num_heads * head_dim
    x = x_ref[0]      # (N, C)   bf16
    val = val_ref[0]  # (N_, C_) bf16

    # projections (q_proj with scale pre-folded; fused k/v projection, no bias)
    q = jnp.dot(x, wq_ref[...], preferred_element_type=jnp.float32)     # (N, AH)  f32
    kv = jnp.dot(val, wkv_ref[...], preferred_element_type=jnp.float32)  # (N_, 2AH) f32
    k = kv[:, :AH]   # lane-aligned slice (AH is a multiple of 128)
    v = kv[:, AH:]

    cos = cos_ref[...]    # (N, AH)
    sin_a = sina_ref[...]  # -sin on even lanes, 0 on odd lanes
    sin_b = sinb_ref[...]  # +sin on odd lanes, 0 on even lanes

    def rope(t):
        # rotate_half(t)*sin == roll(t,+1-ward)*sin_a + roll(t,-1-ward)*sin_b
        # (masked tables zero out the cross-pair / cross-head wrap terms; head_dim is even)
        nxt = pltpu.roll(t, shift=AH - 1, axis=1)   # t[..., i+1]
        prv = pltpu.roll(t, shift=1, axis=1)        # t[..., i-1]
        return t * cos + nxt * sin_a + prv * sin_b

    q = rope(q).astype(jnp.bfloat16)   # scale already folded into wq
    k = rope(k).astype(jnp.bfloat16)
    v = v.astype(jnp.bfloat16)

    # per-head attention (num_heads is small & static); results land in VMEM scratch
    for h in range(num_heads):
        lo = h * head_dim
        qh = q[:, lo:lo + head_dim]
        kh = k[:, lo:lo + head_dim]
        vh = v[:, lo:lo + head_dim]
        # contract over the last dim of both operands -> no transpose of kh
        s = jax.lax.dot_general(qh, kh, (((1,), (1,)), ((), ())),
                                preferred_element_type=jnp.float32)      # (N, N_) f32
        s = s - jnp.max(s, axis=-1, keepdims=True)
        p = jnp.exp(s)
        inv = pl.reciprocal(jnp.sum(p, axis=-1, keepdims=True), approx=True)  # (N, 1)
        oh = jnp.dot(p.astype(jnp.bfloat16), vh, preferred_element_type=jnp.float32)
        o_scratch[:, lo:lo + head_dim] = oh * inv   # normalize the (N,64) output, not (N,N_)

    o = o_scratch[...]  # (N, AH) f32

    # inner_attn_ln: LayerNorm over the last dim, eps = 1e-5 (single pass: sum & sum-of-squares)
    inv_ah = 1.0 / float(AH)
    s1 = jnp.sum(o, axis=-1, keepdims=True)
    s2 = jnp.sum(o * o, axis=-1, keepdims=True)
    mu = s1 * inv_ah
    var = s2 * inv_ah - mu * mu
    ln = (o - mu) * jax.lax.rsqrt(var + 1e-5)
    ln = ln * ln_g_ref[...] + ln_b_ref[...]

    # output projection (with bias)
    y = jnp.dot(ln.astype(jnp.bfloat16), wp_ref[...],
                preferred_element_type=jnp.float32) + bp_ref[...]
    out_ref[0] = y
    # TODO(synk): attn_mask path not implemented (forward is exercised with attn_mask=None).


# ----------------------------------------------------------------------------- wrapper
def mova_attention(x, value, params, *, num_heads, head_dim, rope_hw):
    B, N, C = x.shape
    _, N_, C_ = value.shape
    AH = num_heads * head_dim
    assert head_dim == 64, "rope in the module is hard-coded to head_dim 64"
    assert head_dim % 2 == 0, "rotate_half requires an even head_dim"
    assert N == rope_hw * rope_hw and N_ == rope_hw * rope_hw
    scale = head_dim ** (-0.5)

    # rope tables, tiled across heads; sin split into parity-signed/masked tables
    cos, sin = rope_tables(rope_hw)                    # (N, 64)
    cos_t = jnp.tile(cos, (1, num_heads))              # (N, AH)
    sin_t = jnp.tile(sin, (1, num_heads))
    parity = (jnp.arange(AH) % 2)[None, :]
    sin_a = jnp.where(parity == 0, -sin_t, jnp.zeros_like(sin_t)).astype(jnp.float32)
    sin_b = jnp.where(parity == 1, sin_t, jnp.zeros_like(sin_t)).astype(jnp.float32)

    # weights: pre-transposed, qk-scale folded into wq, k/v fused, bf16 for the MXU
    wq_t = (params["wq"].T * scale).astype(jnp.bfloat16)                         # (C, AH)
    wkv_t = jnp.concatenate([params["wk"].T, params["wv"].T], axis=1).astype(jnp.bfloat16)  # (C_, 2AH)
    wp_t = params["wp"].T.astype(jnp.bfloat16)                                   # (AH, C)
    g2 = params["ln_g"].reshape(1, AH).astype(jnp.float32)
    b2 = params["ln_b"].reshape(1, AH).astype(jnp.float32)
    bp2 = params["bp"].reshape(1, C).astype(jnp.float32)

    x_bf = x.astype(jnp.bfloat16)
    val_bf = value.astype(jnp.bfloat16)

    kernel = functools.partial(_attention_kernel, num_heads, head_dim)

    return pl.pallas_call(
        kernel,
        out_shape=jax.ShapeDtypeStruct((B, N, C), jnp.float32),
        grid=(B,),
        in_specs=[
            pl.BlockSpec((1, N, C), lambda b: (b, 0, 0)),      # x (bf16)
            pl.BlockSpec((1, N_, C_), lambda b: (b, 0, 0)),    # value (bf16)
            pl.BlockSpec((C, AH), lambda b: (0, 0)),           # wq (scale folded, bf16)
            pl.BlockSpec((C_, 2 * AH), lambda b: (0, 0)),      # wkv fused (bf16)
            pl.BlockSpec((N, AH), lambda b: (0, 0)),           # cos
            pl.BlockSpec((N, AH), lambda b: (0, 0)),           # sin_a (-sin on even lanes)
            pl.BlockSpec((N, AH), lambda b: (0, 0)),           # sin_b (+sin on odd lanes)
            pl.BlockSpec((1, AH), lambda b: (0, 0)),           # ln gamma
            pl.BlockSpec((1, AH), lambda b: (0, 0)),           # ln beta
            pl.BlockSpec((AH, C), lambda b: (0, 0)),           # wp (bf16)
            pl.BlockSpec((1, C), lambda b: (0, 0)),            # proj bias
        ],
        out_specs=pl.BlockSpec((1, N, C), lambda b: (b, 0, 0)),
        scratch_shapes=[pltpu.VMEM((N, AH), jnp.float32)],     # per-head output accumulator
        compiler_params=pltpu.CompilerParams(dimension_semantics=("parallel",)),
    )(x_bf, val_bf, wq_t, wkv_t, cos_t, sin_a, sin_b, g2, b2, wp_t, bp2)


# ----------------------------------------------------------------------------- pure-JAX reference
def reference(x, value, params, *, num_heads, head_dim, rope_hw):
    B, N, C = x.shape
    _, N_, C_ = value.shape
    scale = head_dim ** (-0.5)
    cos, sin = rope_tables(rope_hw)  # (N, 64)

    q = x @ params["wq"].T
    k = value @ params["wk"].T
    v = value @ params["wv"].T
    q = q.reshape(B, N, num_heads, head_dim).transpose(0, 2, 1, 3)
    k = k.reshape(B, N_, num_heads, head_dim).transpose(0, 2, 1, 3)
    v = v.reshape(B, N_, num_heads, head_dim).transpose(0, 2, 1, 3)

    def rot_half(t):
        tp = t.reshape(*t.shape[:-1], head_dim // 2, 2)
        t1, t2 = tp[..., 0], tp[..., 1]
        return jnp.stack([-t2, t1], axis=-1).reshape(*t.shape)

    q = q * cos + rot_half(q) * sin
    k = k * cos + rot_half(k) * sin
    q = q * scale
    attn = jax.nn.softmax(jnp.einsum("bhnd,bhmd->bhnm", q, k), axis=-1)
    o = jnp.einsum("bhnm,bhmd->bhnd", attn, v).transpose(0, 2, 1, 3).reshape(B, N, -1)
    mu = jnp.mean(o, axis=-1, keepdims=True)
    var = jnp.mean(jnp.square(o - mu), axis=-1, keepdims=True)
    o = (o - mu) * jax.lax.rsqrt(var + 1e-5) * params["ln_g"] + params["ln_b"]
    return o @ params["wp"].T + params["bp"]


# ----------------------------------------------------------------------------- main
if __name__ == "__main__":
    # Small config consistent with the module:
    #   rope dim is hard-coded to 64//2 => head_dim = 64.
    #   rope_hw = 4 => N = N_ = 16 so the rope table broadcasts exactly as in PyTorch.
    B = 2
    num_heads = 2
    head_dim = 64
    dim = num_heads * head_dim          # 128 (== all_head_dim)
    value_dim = 96
    rope_hw = 4
    N = N_ = rope_hw * rope_hw          # 16

    key = jax.random.PRNGKey(0)
    ks = jax.random.split(key, 8)
    x = jax.random.normal(ks[0], (B, N, dim), dtype=jnp.float32) * 0.5
    value = jax.random.normal(ks[1], (B, N_, value_dim), dtype=jnp.float32) * 0.5

    params = {
        "wq": jax.random.normal(ks[2], (dim, dim), dtype=jnp.float32) * 0.05,        # q_proj.weight
        "wk": jax.random.normal(ks[3], (dim, value_dim), dtype=jnp.float32) * 0.05,  # k_proj.weight
        "wv": jax.random.normal(ks[4], (dim, value_dim), dtype=jnp.float32) * 0.05,  # v_proj.weight
        "ln_g": jnp.ones((dim,), dtype=jnp.float32),                                  # LayerNorm weight
        "ln_b": jnp.zeros((dim,), dtype=jnp.float32),                                 # LayerNorm bias
        "wp": jax.random.normal(ks[5], (dim, dim), dtype=jnp.float32) * 0.05,         # proj.weight
        "bp": jax.random.normal(ks[6], (dim,), dtype=jnp.float32) * 0.05,             # proj.bias
    }

    out = mova_attention(x, value, params, num_heads=num_heads, head_dim=head_dim, rope_hw=rope_hw)
    out = jax.block_until_ready(out)

    ref = reference(x, value, params, num_heads=num_heads, head_dim=head_dim, rope_hw=rope_hw)
    np.testing.assert_allclose(np.asarray(out), np.asarray(ref), rtol=2e-2, atol=2e-2)

    print("KERNEL_OK")
</pallas_src>

<mosaic_0001>
module attributes {stable_mosaic.version = 11 : i64} {
  func.func @_attention_kernel(%arg0: i32, %arg1: memref<1x16x128xbf16, #tpu.memory_space<vmem>>, %arg2: memref<1x16x96xbf16, #tpu.memory_space<vmem>>, %arg3: memref<128x128xbf16, #tpu.memory_space<vmem>>, %arg4: memref<96x256xbf16, #tpu.memory_space<vmem>>, %arg5: memref<16x128xf32, #tpu.memory_space<vmem>>, %arg6: memref<16x128xf32, #tpu.memory_space<vmem>>, %arg7: memref<16x128xf32, #tpu.memory_space<vmem>>, %arg8: memref<1x128xf32, #tpu.memory_space<vmem>>, %arg9: memref<1x128xf32, #tpu.memory_space<vmem>>, %arg10: memref<128x128xbf16, #tpu.memory_space<vmem>>, %arg11: memref<1x128xf32, #tpu.memory_space<vmem>>, %arg12: memref<1x16x128xf32, #tpu.memory_space<vmem>>, %arg13: memref<16x128xf32, #tpu.memory_space<vmem>>) attributes {dimension_semantics = [#tpu.dimension_semantics<parallel>], iteration_bounds = array<i64: 2>, scalar_prefetch = 0 : i64, scratch_operands = 1 : i64, tpu.core_type = #tpu.core_type<tc>, window_params = [{transform_indices = @transform_0, window_bounds = array<i64: 1, 16, 128>}, {transform_indices = @transform_1, window_bounds = array<i64: 1, 16, 96>}, {pipeline_mode = #tpu.pipeline_mode<synchronous>, transform_indices = @transform_2, window_bounds = array<i64: 128, 128>}, {pipeline_mode = #tpu.pipeline_mode<synchronous>, transform_indices = @transform_3, window_bounds = array<i64: 96, 256>}, {pipeline_mode = #tpu.pipeline_mode<synchronous>, transform_indices = @transform_4, window_bounds = array<i64: 16, 128>}, {pipeline_mode = #tpu.pipeline_mode<synchronous>, transform_indices = @transform_5, window_bounds = array<i64: 16, 128>}, {pipeline_mode = #tpu.pipeline_mode<synchronous>, transform_indices = @transform_6, window_bounds = array<i64: 16, 128>}, {pipeline_mode = #tpu.pipeline_mode<synchronous>, transform_indices = @transform_7, window_bounds = array<i64: 1, 128>}, {pipeline_mode = #tpu.pipeline_mode<synchronous>, transform_indices = @transform_8, window_bounds = array<i64: 1, 128>}, {pipeline_mode = #tpu.pipeline_mode<synchronous>, transform_indices = @transform_9, window_bounds = array<i64: 128, 128>}, {pipeline_mode = #tpu.pipeline_mode<synchronous>, transform_indices = @transform_10, window_bounds = array<i64: 1, 128>}, {transform_indices = @transform_11, window_bounds = array<i64: 1, 16, 128>}]} {
    %c0 = arith.constant 0 : index
    %c0_0 = arith.constant 0 : index
    %c0_1 = arith.constant 0 : index
    %0 = vector.load %arg1[%c0, %c0_0, %c0_1] : memref<1x16x128xbf16, #tpu.memory_space<vmem>>, vector<1x16x128xbf16>
    %1 = vector.shape_cast %0 : vector<1x16x128xbf16> to vector<16x128xbf16>
    %c0_2 = arith.constant 0 : index
    %c0_3 = arith.constant 0 : index
    %c0_4 = arith.constant 0 : index
    %2 = vector.load %arg2[%c0_2, %c0_3, %c0_4] : memref<1x16x96xbf16, #tpu.memory_space<vmem>>, vector<1x16x96xbf16>
    %3 = vector.shape_cast %2 : vector<1x16x96xbf16> to vector<16x96xbf16>
    %c0_5 = arith.constant 0 : index
    %c0_6 = arith.constant 0 : index
    %4 = vector.load %arg3[%c0_5, %c0_6] : memref<128x128xbf16, #tpu.memory_space<vmem>>, vector<128x128xbf16>
    %cst = arith.constant dense<0.000000e+00> : vector<16x128xf32>
    %5 = tpu.matmul %1, %4, %cst {dimension_numbers = #tpu.dot_dimension_numbers<[1], [0], [0], [1], [0, 0, 1, 1], [], []>} : vector<16x128xbf16>, vector<128x128xbf16>, vector<16x128xf32> -> vector<16x128xf32>
    %c0_7 = arith.constant 0 : index
    %c0_8 = arith.constant 0 : index
    %6 = vector.load %arg4[%c0_7, %c0_8] : memref<96x256xbf16, #tpu.memory_space<vmem>>, vector<96x256xbf16>
    %cst_9 = arith.constant dense<0.000000e+00> : vector<16x256xf32>
    %7 = tpu.matmul %3, %6, %cst_9 {dimension_numbers = #tpu.dot_dimension_numbers<[1], [0], [0], [1], [0, 0, 1, 1], [], []>} : vector<16x96xbf16>, vector<96x256xbf16>, vector<16x256xf32> -> vector<16x256xf32>
    %8 = vector.extract_strided_slice %7 {offsets = [0, 0], sizes = [16, 128], strides = [1, 1]} : vector<16x256xf32> to vector<16x128xf32>
    %9 = vector.extract_strided_slice %7 {offsets = [0, 128], sizes = [16, 128], strides = [1, 1]} : vector<16x256xf32> to vector<16x128xf32>
    %c0_10 = arith.constant 0 : index
    %c0_11 = arith.constant 0 : index
    %10 = vector.load %arg5[%c0_10, %c0_11] : memref<16x128xf32, #tpu.memory_space<vmem>>, vector<16x128xf32>
    %c0_12 = arith.constant 0 : index
    %c0_13 = arith.constant 0 : index
    %11 = vector.load %arg6[%c0_12, %c0_13] : memref<16x128xf32, #tpu.memory_space<vmem>>, vector<16x128xf32>
    %c0_14 = arith.constant 0 : index
    %c0_15 = arith.constant 0 : index
    %12 = vector.load %arg7[%c0_14, %c0_15] : memref<16x128xf32, #tpu.memory_space<vmem>>, vector<16x128xf32>
    %c127_i32 = arith.constant 127 : i32
    %13 = tpu.dynamic_rotate %5 by %c127_i32 dim 1 : vector<16x128xf32>, i32 -> vector<16x128xf32>
    %c1_i32 = arith.constant 1 : i32
    %14 = tpu.dynamic_rotate %5 by %c1_i32 dim 1 : vector<16x128xf32>, i32 -> vector<16x128xf32>
    %15 = arith.mulf %5, %10 : vector<16x128xf32>
    %16 = arith.mulf %13, %11 : vector<16x128xf32>
    %17 = arith.addf %15, %16 : vector<16x128xf32>
    %18 = arith.mulf %14, %12 : vector<16x128xf32>
    %19 = arith.addf %17, %18 : vector<16x128xf32>
    %20 = arith.truncf %19 : vector<16x128xf32> to vector<16x128xbf16>
    %c127_i32_16 = arith.constant 127 : i32
    %21 = tpu.dynamic_rotate %8 by %c127_i32_16 dim 1 : vector<16x128xf32>, i32 -> vector<16x128xf32>
    %c1_i32_17 = arith.constant 1 : i32
    %22 = tpu.dynamic_rotate %8 by %c1_i32_17 dim 1 : vector<16x128xf32>, i32 -> vector<16x128xf32>
    %23 = arith.mulf %8, %10 : vector<16x128xf32>
    %24 = arith.mulf %21, %11 : vector<16x128xf32>
    %25 = arith.addf %23, %24 : vector<16x128xf32>
    %26 = arith.mulf %22, %12 : vector<16x128xf32>
    %27 = arith.addf %25, %26 : vector<16x128xf32>
    %28 = arith.truncf %27 : vector<16x128xf32> to vector<16x128xbf16>
    %29 = arith.truncf %9 : vector<16x128xf32> to vector<16x128xbf16>
    %30 = vector.extract_strided_slice %20 {offsets = [0, 0], sizes = [16, 64], strides = [1, 1]} : vector<16x128xbf16> to vector<16x64xbf16>
    %31 = vector.extract_strided_slice %28 {offsets = [0, 0], sizes = [16, 64], strides = [1, 1]} : vector<16x128xbf16> to vector<16x64xbf16>
    %32 = vector.extract_strided_slice %29 {offsets = [0, 0], sizes = [16, 64], strides = [1, 1]} : vector<16x128xbf16> to vector<16x64xbf16>
    %cst_18 = arith.constant dense<0.000000e+00> : vector<16x16xf32>
    %33 = tpu.matmul %30, %31, %cst_18 {dimension_numbers = #tpu.dot_dimension_numbers<[1], [1], [0], [0], [0, 0, 1, 0], [], []>} : vector<16x64xbf16>, vector<16x64xbf16>, vector<16x16xf32> -> vector<16x16xf32>
    %cst_19 = arith.constant dense<0xFF800000> : vector<16xf32>
    %34 = vector.multi_reduction <maximumf>, %33, %cst_19 [1] : vector<16x16xf32> to vector<16xf32>
    %35 = vector.shape_cast %34 : vector<16xf32> to vector<16x1xf32>
    %36 = vector.broadcast %35 : vector<16x1xf32> to vector<16x16xf32>
    %37 = arith.subf %33, %36 : vector<16x16xf32>
    %38 = math.exp %37 : vector<16x16xf32>
    %cst_20 = arith.constant dense<0.000000e+00> : vector<16xf32>
    %39 = vector.multi_reduction <add>, %38, %cst_20 [1] : vector<16x16xf32> to vector<16xf32>
    %40 = vector.shape_cast %39 : vector<16xf32> to vector<16x1xf32>
    %41 = tpu.reciprocal %40 {approx = true} : vector<16x1xf32> -> vector<16x1xf32>
    %42 = arith.truncf %38 : vector<16x16xf32> to vector<16x16xbf16>
    %cst_21 = arith.constant dense<0.000000e+00> : vector<16x64xf32>
    %43 = tpu.matmul %42, %32, %cst_21 {dimension_numbers = #tpu.dot_dimension_numbers<[1], [0], [0], [1], [0, 0, 1, 1], [], []>} : vector<16x16xbf16>, vector<16x64xbf16>, vector<16x64xf32> -> vector<16x64xf32>
    %44 = vector.broadcast %41 : vector<16x1xf32> to vector<16x64xf32>
    %45 = arith.mulf %43, %44 : vector<16x64xf32>
    %c0_22 = arith.constant 0 : index
    %c0_23 = arith.constant 0 : index
    %46 = vector.load %arg13[%c0_22, %c0_23] : memref<16x128xf32, #tpu.memory_space<vmem>>, vector<16x64xf32>
    tpu.vector_store %arg13[%c0_22, %c0_23], %45 {strides = array<i32>} : memref<16x128xf32, #tpu.memory_space<vmem>>, vector<16x64xf32>,
    %47 = vector.extract_strided_slice %20 {offsets = [0, 64], sizes = [16, 64], strides = [1, 1]} : vector<16x128xbf16> to vector<16x64xbf16>
    %48 = vector.extract_strided_slice %28 {offsets = [0, 64], sizes = [16, 64], strides = [1, 1]} : vector<16x128xbf16> to vector<16x64xbf16>
    %49 = vector.extract_strided_slice %29 {offsets = [0, 64], sizes = [16, 64], strides = [1, 1]} : vector<16x128xbf16> to vector<16x64xbf16>
    %cst_24 = arith.constant dense<0.000000e+00> : vector<16x16xf32>
    %50 = tpu.matmul %47, %48, %cst_24 {dimension_numbers = #tpu.dot_dimension_numbers<[1], [1], [0], [0], [0, 0, 1, 0], [], []>} : vector<16x64xbf16>, vector<16x64xbf16>, vector<16x16xf32> -> vector<16x16xf32>
    %cst_25 = arith.constant dense<0xFF800000> : vector<16xf32>
    %51 = vector.multi_reduction <maximumf>, %50, %cst_25 [1] : vector<16x16xf32> to vector<16xf32>
    %52 = vector.shape_cast %51 : vector<16xf32> to vector<16x1xf32>
    %53 = vector.broadcast %52 : vector<16x1xf32> to vector<16x16xf32>
    %54 = arith.subf %50, %53 : vector<16x16xf32>
    %55 = math.exp %54 : vector<16x16xf32>
    %cst_26 = arith.constant dense<0.000000e+00> : vector<16xf32>
    %56 = vector.multi_reduction <add>, %55, %cst_26 [1] : vector<16x16xf32> to vector<16xf32>
    %57 = vector.shape_cast %56 : vector<16xf32> to vector<16x1xf32>
    %58 = tpu.reciprocal %57 {approx = true} : vector<16x1xf32> -> vector<16x1xf32>
    %59 = arith.truncf %55 : vector<16x16xf32> to vector<16x16xbf16>
    %cst_27 = arith.constant dense<0.000000e+00> : vector<16x64xf32>
    %60 = tpu.matmul %59, %49, %cst_27 {dimension_numbers = #tpu.dot_dimension_numbers<[1], [0], [0], [1], [0, 0, 1, 1], [], []>} : vector<16x16xbf16>, vector<16x64xbf16>, vector<16x64xf32> -> vector<16x64xf32>
    %61 = vector.broadcast %58 : vector<16x1xf32> to vector<16x64xf32>
    %62 = arith.mulf %60, %61 : vector<16x64xf32>
    %c0_28 = arith.constant 0 : index
    %c64 = arith.constant 64 : index
    %63 = vector.load %arg13[%c0_28, %c64] : memref<16x128xf32, #tpu.memory_space<vmem>>, vector<16x64xf32>
    tpu.vector_store %arg13[%c0_28, %c64], %62 {strides = array<i32>} : memref<16x128xf32, #tpu.memory_space<vmem>>, vector<16x64xf32>,
    %c0_29 = arith.constant 0 : index
    %c0_30 = arith.constant 0 : index
    %64 = vector.load %arg13[%c0_29, %c0_30] : memref<16x128xf32, #tpu.memory_space<vmem>>, vector<16x128xf32>
    %cst_31 = arith.constant dense<0.000000e+00> : vector<16xf32>
    %65 = vector.multi_reduction <add>, %64, %cst_31 [1] : vector<16x128xf32> to vector<16xf32>
    %66 = vector.shape_cast %65 : vector<16xf32> to vector<16x1xf32>
    %67 = arith.mulf %64, %64 : vector<16x128xf32>
    %cst_32 = arith.constant dense<0.000000e+00> : vector<16xf32>
    %68 = vector.multi_reduction <add>, %67, %cst_32 [1] : vector<16x128xf32> to vector<16xf32>
    %69 = vector.shape_cast %68 : vector<16xf32> to vector<16x1xf32>
    %cst_33 = arith.constant 7.812500e-03 : f32
    %70 = vector.broadcast %cst_33 : f32 to vector<16x1xf32>
    %71 = arith.mulf %66, %70 : vector<16x1xf32>
    %cst_34 = arith.constant 7.812500e-03 : f32
    %72 = vector.broadcast %cst_34 : f32 to vector<16x1xf32>
    %73 = arith.mulf %69, %72 : vector<16x1xf32>
    %74 = arith.mulf %71, %71 : vector<16x1xf32>
    %75 = arith.subf %73, %74 : vector<16x1xf32>
    %76 = vector.broadcast %71 : vector<16x1xf32> to vector<16x128xf32>
    %77 = arith.subf %64, %76 : vector<16x128xf32>
    %cst_35 = arith.constant 9.99999974E-6 : f32
    %78 = vector.broadcast %cst_35 : f32 to vector<16x1xf32>
    %79 = arith.addf %75, %78 : vector<16x1xf32>
    %80 = math.rsqrt %79 : vector<16x1xf32>
    %81 = vector.broadcast %80 : vector<16x1xf32> to vector<16x128xf32>
    %82 = arith.mulf %77, %81 : vector<16x128xf32>
    %c0_36 = arith.constant 0 : index
    %c0_37 = arith.constant 0 : index
    %83 = vector.load %arg8[%c0_36, %c0_37] : memref<1x128xf32, #tpu.memory_space<vmem>>, vector<1x128xf32>
    %84 = vector.broadcast %83 : vector<1x128xf32> to vector<16x128xf32>
    %85 = arith.mulf %82, %84 : vector<16x128xf32>
    %c0_38 = arith.constant 0 : index
    %c0_39 = arith.constant 0 : index
    %86 = vector.load %arg9[%c0_38, %c0_39] : memref<1x128xf32, #tpu.memory_space<vmem>>, vector<1x128xf32>
    %87 = vector.broadcast %86 : vector<1x128xf32> to vector<16x128xf32>
    %88 = arith.addf %85, %87 : vector<16x128xf32>
    %89 = arith.truncf %88 : vector<16x128xf32> to vector<16x128xbf16>
    %c0_40 = arith.constant 0 : index
    %c0_41 = arith.constant 0 : index
    %90 = vector.load %arg10[%c0_40, %c0_41] : memref<128x128xbf16, #tpu.memory_space<vmem>>, vector<128x128xbf16>
    %cst_42 = arith.constant dense<0.000000e+00> : vector<16x128xf32>
    %91 = tpu.matmul %89, %90, %cst_42 {dimension_numbers = #tpu.dot_dimension_numbers<[1], [0], [0], [1], [0, 0, 1, 1], [], []>} : vector<16x128xbf16>, vector<128x128xbf16>, vector<16x128xf32> -> vector<16x128xf32>
    %c0_43 = arith.constant 0 : index
    %c0_44 = arith.constant 0 : index
    %92 = vector.load %arg11[%c0_43, %c0_44] : memref<1x128xf32, #tpu.memory_space<vmem>>, vector<1x128xf32>
    %93 = vector.broadcast %92 : vector<1x128xf32> to vector<16x128xf32>
    %94 = arith.addf %91, %93 : vector<16x128xf32>
    %c0_45 = arith.constant 0 : index
    %c0_46 = arith.constant 0 : index
    %c0_47 = arith.constant 0 : index
    %95 = vector.load %arg12[%c0_45, %c0_46, %c0_47] : memref<1x16x128xf32, #tpu.memory_space<vmem>>, vector<1x16x128xf32>
    %96 = vector.shape_cast %95 : vector<1x16x128xf32> to vector<16x128xf32>
    %97 = vector.shape_cast %94 : vector<16x128xf32> to vector<1x16x128xf32>
    tpu.vector_store %arg12[%c0_45, %c0_46, %c0_47], %97 {strides = array<i32>} : memref<1x16x128xf32, #tpu.memory_space<vmem>>, vector<1x16x128xf32>,
    return
  }
  func.func @transform_0(%arg0: i32) -> (i32, i32, i32) {
    %c0_i32 = arith.constant 0 : i32
    %c0_i32_0 = arith.constant 0 : i32
    %c0_i32_1 = arith.constant 0 : i32
    return %arg0, %c0_i32, %c0_i32_0 : i32, i32, i32
  }
  func.func @transform_1(%arg0: i32) -> (i32, i32, i32) {
    %c0_i32 = arith.constant 0 : i32
    %c0_i32_0 = arith.constant 0 : i32
    %c0_i32_1 = arith.constant 0 : i32
    return %arg0, %c0_i32, %c0_i32_0 : i32, i32, i32
  }
  func.func @transform_2(%arg0: i32) -> (i32, i32) {
    %c0_i32 = arith.constant 0 : i32
    %c0_i32_0 = arith.constant 0 : i32
    %c0_i32_1 = arith.constant 0 : i32
    return %c0_i32, %c0_i32_0 : i32, i32
  }
  func.func @transform_3(%arg0: i32) -> (i32, i32) {
    %c0_i32 = arith.constant 0 : i32
    %c0_i32_0 = arith.constant 0 : i32
    %c0_i32_1 = arith.constant 0 : i32
    return %c0_i32, %c0_i32_0 : i32, i32
  }
  func.func @transform_4(%arg0: i32) -> (i32, i32) {
    %c0_i32 = arith.constant 0 : i32
    %c0_i32_0 = arith.constant 0 : i32
    %c0_i32_1 = arith.constant 0 : i32
    return %c0_i32, %c0_i32_0 : i32, i32
  }
  func.func @transform_5(%arg0: i32) -> (i32, i32) {
    %c0_i32 = arith.constant 0 : i32
    %c0_i32_0 = arith.constant 0 : i32
    %c0_i32_1 = arith.constant 0 : i32
    return %c0_i32, %c0_i32_0 : i32, i32
  }
  func.func @transform_6(%arg0: i32) -> (i32, i32) {
    %c0_i32 = arith.constant 0 : i32
    %c0_i32_0 = arith.constant 0 : i32
    %c0_i32_1 = arith.constant 0 : i32
    return %c0_i32, %c0_i32_0 : i32, i32
  }
  func.func @transform_7(%arg0: i32) -> (i32, i32) {
    %c0_i32 = arith.constant 0 : i32
    %c0_i32_0 = arith.constant 0 : i32
    %c0_i32_1 = arith.constant 0 : i32
    return %c0_i32, %c0_i32_0 : i32, i32
  }
  func.func @transform_8(%arg0: i32) -> (i32, i32) {
    %c0_i32 = arith.constant 0 : i32
    %c0_i32_0 = arith.constant 0 : i32
    %c0_i32_1 = arith.constant 0 : i32
    return %c0_i32, %c0_i32_0 : i32, i32
  }
  func.func @transform_9(%arg0: i32) -> (i32, i32) {
    %c0_i32 = arith.constant 0 : i32
    %c0_i32_0 = arith.constant 0 : i32
    %c0_i32_1 = arith.constant 0 : i32
    return %c0_i32, %c0_i32_0 : i32, i32
  }
  func.func @transform_10(%arg0: i32) -> (i32, i32) {
    %c0_i32 = arith.constant 0 : i32
    %c0_i32_0 = arith.constant 0 : i32
    %c0_i32_1 = arith.constant 0 : i32
    return %c0_i32, %c0_i32_0 : i32, i32
  }
  func.func @transform_11(%arg0: i32) -> (i32, i32, i32) {
    %c0_i32 = arith.constant 0 : i32
    %c0_i32_0 = arith.constant 0 : i32
    %c0_i32_1 = arith.constant 0 : i32
    return %arg0, %c0_i32, %c0_i32_0 : i32, i32, i32
  }
}

</mosaic_0001>

<bundles_post_ra>
// kernel: tpu_custom_call.1
= control target key start
LH: loop header
LB: loop body
LE: loop exit
PB: predicated region body
PF: predicated region fallthrough
CT: control target
= control target key end

     0   :  { %s2506_s0 = inlined_call_operand.hbm [shape: bf16[2,16,128], index: 0, kind: input, shape index: {}]   ;;  %s2507_s1 = inlined_call_operand.hbm [shape: bf16[2,16,96], index: 1, kind: input, shape index: {}]   ;;  %s2508_s2 = inlined_call_operand.hbm [shape: bf16[128,128], index: 2, kind: input, shape index: {}]   ;;  %s2509_s3 = inlined_call_operand.hbm [shape: bf16[96,256], index: 3, kind: input, shape index: {}]   ;;  %s2510_s4 = inlined_call_operand.hbm [shape: f32[16,128], index: 4, kind: input, shape index: {}]   ;;  %s2511_s5 = inlined_call_operand.vmem [shape: f32[16,128], index: 5, kind: input, shape index: {}]   ;;  %s2512_s6 = inlined_call_operand.hbm [shape: f32[16,128], index: 6, kind: input, shape index: {}]   ;;  %s2513_s7 = inlined_call_operand.vmem [shape: f32[1,128], index: 7, kind: input, shape index: {}]   ;;  %s2514_s8 = inlined_call_operand.vmem [shape: f32[1,128], index: 8, kind: input, shape index: {}]   ;;  %s2515_s9 = inlined_call_operand.hbm [shape: bf16[128,128], index: 9, kind: input, shape index: {}]   ;;  %s2516_s10 = inlined_call_operand.vmem [shape: f32[1,128], index: 10, kind: input, shape index: {}]   ;;  %s2517_s11 = inlined_call_operand.hbm [shape: f32[2,16,128], index: 11, kind: output, shape index: {}]  }
   0x1   :  { %2527 = sst [smem:[#allocation24_spill]] %s2508_s2 }
   0x2   :  { %2528 = sst [smem:[#allocation25_spill]] %s2509_s3 }
   0x3   :  { %2529 = sst [smem:[#allocation26_spill]] %s2510_s4 }
   0x4   :  { %2530 = sst [smem:[#allocation27_spill]] %s2512_s6 }
   0x5   :  { %2531 = sst [smem:[#allocation28_spill]] %s2514_s8 }
   0x6   :  { %2532 = sst [smem:[#allocation29_spill]] %s2515_s9 }
   0x7   :  { %2533 = sst [smem:[#allocation30_spill]] %s2516_s10 }
   0x8   :  { %2534 = sst [smem:[#allocation31_spill]] %s2517_s11 }
   0x9   :  { %16 = vsyncpa [#allocation4], 0 }
   0xa   :  { %18 = vsyncpa [#allocation4 + $0x1], 0 }
   0xb   :  { %19 = vsyncpa [#allocation7], 0 }
   0xc   :  { %21 = vsyncpa [#allocation7 + $0x1], 0 }
   0xd   :  { %22 = vsyncpa [#allocation10], 0 }
   0xe   :  { %23 = vsyncpa [#allocation13], 0 }
   0xf   :  { %24 = vsyncpa [#allocation5], 0 }
  0x10   :  { %26 = vsyncpa [#allocation5 + $0x1], 0  ;;  %s2066_s17 = smov 0   ;;  %s2068_s18 = smov 0  }
  0x11   :  { %s2070_s19 = smov 0   ;;  %s2072_s20 = smov 0  }
  0x12 LB: > { %2535 = sst [smem:[#allocation22_spill]] %s1980_s19  ;;  %s1986_s21 = smov [#allocation8]   ;;  %s1984_s20 = sphi %s2072_s20, %s2569_s20   ;;  %s1980_s19 = sphi %s2070_s19, %s2566_s19   ;;  %s1976_s18 = sphi %s2068_s18, %s2568_s18   ;;  %s1972_s17 = sphi %s2066_s17, %s2567_s17  }
  0x13   : > { %s316_s22 = sshll.u32 %s1986_s21, 4  ;;  %s2087_s23 = sadd.s32 4294967295, %s1984_s20   ;;  %s2092_s22 = int_to_ptr.vmem [resolvable:$true] %s316_s22 }
  0x14   : > { %p1374_p0 = scmp.ge.s32.totalorder %s1984_s20, 1  ;;  %p2521_p1 = scmp.eq.s32.totalorder %s2087_s23, 0 }
  0x15   : > { %p304_p2 = scmp.lt.s32.totalorder %s1984_s20, 3  ;;  %s1987_s25 = smov [#allocation9]  }
  0x16   : > { %s329_s26 = sshll.u32 %s1987_s25, 4  ;;  %s1988_s28 = smov [#allocation12]   ;;  %s2107_s26 = int_to_ptr.vmem [resolvable:$true] %s329_s26 }
  0x17   : > { %p2094_p3 = pnand %p1374_p0, %p304_p2  ;;  %s2109_s29 = sshll.u32 %s1988_s28, 4  ;;  %s359_s29 = int_to_ptr.vmem [resolvable:$true] %s2109_s29 }
  0x18   : > { %s2538_s2 = sld [smem:[#allocation24_spill]] }
  0x19   : > { %s2536_s24 = scalar_select %p2094_p3, 1, 0 }
  0x1a   : > { %p1558_p5 = pneg %p2094_p3 }
  0x1c   : > { %p2103_p6 = pnand %p1558_p5, %p2521_p1 }
  0x1e   : > { %s1702_s13 = scalar_lea.hbm %s2538_s2, 1024  ;;  %p2119_p8 = pneg %p2103_p6 }
  0x1f   : > { %p1703_p7 = scmp.ne.s32.totalorder %s2538_s2, %s1702_s13  ;;  %p1709_p11 = scmp.lt.u32.totalorder %s1702_s13, %s2538_s2 }
  0x21   : > { %p1705_p9 = pnand %p2119_p8, %p1703_p7 }
  0x23   : > { %p1706_p10 = pneg %p1705_p9 }
  0x25   : > { %p1711_p12 = pnand %p1709_p11, %p1706_p10 }
  0x27   : > { %1714 = shalt.err (!%p1711_p12)
}
  0x28   : > { %s1715_s28 = scalar_lea.vmem %s2092_s22, 1024  ;;  %p1723_p5 = scmp.lt.s32.totalorder %s2092_s22, %s2092_s22 }
  0x29   : > { %p1716_p13 = scmp.ne.s32.totalorder %s2092_s22, %s1715_s28  ;;  %p1724_p4 = scmp.lt.s32.totalorder %s1715_s28, %s1715_s28 }
  0x2b   : > { %p1718_p0 = pnand %p1716_p13, %p2119_p8  ;;  %p1725_p7 = por %p1724_p4, %p1723_p5 }
  0x2d   : > { %p1719_p2 = pneg %p1718_p0 }
  0x2f   : > { %p1726_p9 = pnand %p1725_p7, %p1719_p2 }
  0x31   : > { %1729 = shalt.err (!%p1726_p9)
}
  0x32   : > { %s2519_s30 = smov 64   ;;  %s2523_s12 = smov 4  }
  0x33   : > { %1561 = dma.hbm_to_vmem [thread:$0]  (!%p2103_p6), %s2538_s2, 1024, %s2092_s22, [#allocation7], %s2519_s30, %s2519_s30, %s2523_s12  }
  0x34   : > { %s2540_s3 = sld [smem:[#allocation25_spill]] }
  0x3a   : > { %s1730_s25 = scalar_lea.hbm %s2540_s3, 1536 }
  0x3b   : > { %p1731_p4 = scmp.ne.s32.totalorder %s2540_s3, %s1730_s25  ;;  %p1737_p12 = scmp.lt.u32.totalorder %s1730_s25, %s2540_s3 }
  0x3d   : > { %p1733_p10 = pnand %p1731_p4, %p2119_p8 }
  0x3f   : > { %p1734_p11 = pneg %p1733_p10 }
  0x41   : > { %p1739_p13 = pnand %p1737_p12, %p1734_p11 }
  0x43   : > { %1742 = shalt.err (!%p1739_p13)
}
  0x44   : > { %s1743_s22 = scalar_lea.vmem %s2107_s26, 1536  ;;  %p1751_p7 = scmp.lt.s32.totalorder %s2107_s26, %s2107_s26 }
  0x45   : > { %p1744_p0 = scmp.ne.s32.totalorder %s2107_s26, %s1743_s22  ;;  %p1752_p9 = scmp.lt.s32.totalorder %s1743_s22, %s1743_s22 }
  0x47   : > { %p1746_p2 = pnand %p1744_p0, %p2119_p8  ;;  %p1753_p4 = por %p1752_p9, %p1751_p7 }
  0x49   : > { %p1747_p5 = pneg %p1746_p2 }
  0x4b   : > { %p1754_p10 = pnand %p1753_p4, %p1747_p5 }
  0x4d   : > { %1757 = shalt.err (!%p1754_p10)
}
  0x4e   : > { %s1991_s11 = smov 128   ;;  %s1992_s8 = smov 8  }
  0x4f   : > { %1564 = dma.hbm_to_vmem [thread:$0]  (!%p2103_p6), %s2540_s3, 1536, %s2107_s26, [#allocation10], %s1991_s11, %s1991_s11, %s1992_s8  }
  0x50   : > { %s2541_s6 = sld [smem:[#allocation27_spill]] }
  0x56   : > { %s1758_s21 = scalar_lea.hbm %s2541_s6, 256 }
  0x57   : > { %p1759_p11 = scmp.ne.s32.totalorder %s2541_s6, %s1758_s21  ;;  %p1765_p0 = scmp.lt.u32.totalorder %s1758_s21, %s2541_s6 }
  0x59   : > { %p1761_p12 = pnand %p1759_p11, %p2119_p8 }
  0x5b   : > { %p1762_p13 = pneg %p1761_p12 }
  0x5d   : > { %p1767_p2 = pnand %p1765_p0, %p1762_p13 }
  0x5f   : > { %1770 = shalt.err (!%p1767_p2)
}
  0x60   : > { %s1771_s10 = scalar_lea.vmem %s359_s29, 256  ;;  %p1779_p4 = scmp.lt.s32.totalorder %s359_s29, %s359_s29 }
  0x61   : > { %p1772_p5 = scmp.ne.s32.totalorder %s359_s29, %s1771_s10  ;;  %p1780_p10 = scmp.lt.s32.totalorder %s1771_s10, %s1771_s10 }
  0x63   : > { %p1774_p7 = pnand %p1772_p5, %p2119_p8  ;;  %p1781_p1 = por %p1780_p10, %p1779_p4 }
  0x65   : > { %p1775_p9 = pneg %p1774_p7 }
  0x67   : > { %p1782_p3 = pnand %p1781_p1, %p1775_p9 }
  0x69   : > { %1785 = shalt.err (!%p1782_p3)
}
  0x6a   : > { %1570 = dma.hbm_to_vmem [thread:$0]  (!%p2103_p6), %s2541_s6, 256, %s359_s29, [#allocation13], %s1991_s11, %s1991_s11, %s1992_s8  }
  0x6b   : > { %s1993_s13 = smov [#allocation11]   ;;  %s1994_s15 = smov [#allocation14]  }
  0x6c   : > { %s342_s14 = sshll.u32 %s1993_s13, 4  ;;  %s377_s21 = sshll.u32 %s1994_s15, 4  ;;  %s343_s14 = int_to_ptr.vmem [resolvable:$true] %s342_s14  ;;  %s378_s21 = int_to_ptr.vmem [resolvable:$true] %s377_s21 }
  0x6d   : > { %s2542_s4 = sld [smem:[#allocation26_spill]] }
  0x73   : > { %s1786_s22 = scalar_lea.hbm %s2542_s4, 256 }
  0x74   : > { %p1787_p1 = scmp.ne.s32.totalorder %s2542_s4, %s1786_s22  ;;  %p1793_p12 = scmp.lt.u32.totalorder %s1786_s22, %s2542_s4 }
  0x76   : > { %p1789_p3 = pnand %p1787_p1, %p2119_p8 }
  0x78   : > { %p1790_p11 = pneg %p1789_p3 }
  0x7a   : > { %p1795_p13 = pnand %p1793_p12, %p1790_p11 }
  0x7c   : > { %1798 = shalt.err (!%p1795_p13)
}
  0x7d   : > { %s1799_s29 = scalar_lea.vmem %s343_s14, 256  ;;  %p1807_p7 = scmp.lt.s32.totalorder %s343_s14, %s343_s14 }
  0x7e   : > { %p1800_p0 = scmp.ne.s32.totalorder %s343_s14, %s1799_s29  ;;  %p1808_p9 = scmp.lt.s32.totalorder %s1799_s29, %s1799_s29 }
  0x80   : > { %p1802_p2 = pnand %p1800_p0, %p2119_p8  ;;  %p1809_p4 = por %p1808_p9, %p1807_p7 }
  0x82   : > { %p1803_p5 = pneg %p1802_p2 }
  0x84   : > { %p1810_p10 = pnand %p1809_p4, %p1803_p5 }
  0x86   : > { %1813 = shalt.err (!%p1810_p10)
}
  0x87   : > { %1567 = dma.hbm_to_vmem [thread:$0]  (!%p2103_p6), %s2542_s4, 256, %s343_s14, [#allocation10], %s1991_s11, %s1991_s11, %s1992_s8  }
  0x88   : > { %s2543_s9 = sld [smem:[#allocation29_spill]] }
  0x8e   : > { %s1814_s15 = scalar_lea.hbm %s2543_s9, 1024 }
  0x8f   : > { %p1815_p1 = scmp.ne.s32.totalorder %s2543_s9, %s1814_s15  ;;  %p1821_p12 = scmp.lt.u32.totalorder %s1814_s15, %s2543_s9 }
  0x91   : > { %p1817_p3 = pnand %p1815_p1, %p2119_p8 }
  0x93   : > { %p1818_p11 = pneg %p1817_p3 }
  0x95   : > { %p1823_p13 = pnand %p1821_p12, %p1818_p11 }
  0x97   : > { %1826 = shalt.err (!%p1823_p13)
}
  0x98   : > { %s1827_s26 = scalar_lea.vmem %s378_s21, 1024  ;;  %p1835_p7 = scmp.lt.s32.totalorder %s378_s21, %s378_s21 }
  0x99   : > { %p1828_p0 = scmp.ne.s32.totalorder %s378_s21, %s1827_s26  ;;  %p1836_p9 = scmp.lt.s32.totalorder %s1827_s26, %s1827_s26 }
  0x9b   : > { %p1830_p2 = pnand %p1828_p0, %p2119_p8  ;;  %p1837_p4 = por %p1836_p9, %p1835_p7 }
  0x9d   : > { %p1831_p5 = pneg %p1830_p2 }
  0x9f   : > { %p1838_p10 = pnand %p1837_p4, %p1831_p5 }
  0xa1   : > { %1841 = shalt.err (!%p1838_p10)
}
  0xa2   : > { %s2544_s11 = smov 4   ;;  %s2545_s8 = smov 64  }
  0xa3   : > { %1573 = dma.hbm_to_vmem [thread:$0]  (!%p2103_p6), %s2543_s9, 1024, %s378_s21, [#allocation13], %s2545_s8, %s2545_s8, %s2544_s11  }
  0xa4   : > { %s1373_s27 = sadd.s32 4294967294, %s1984_s20   ;;  %s2235_s16 = sadd.s32 1, %s1984_s20  }
  0xa5   : > { %s39_s2 = sadd.s32 1, %s1980_s19  ;;  %s36_s12 = ssub.s32 %s1984_s20, %s2235_s16 }
  0xa6   : > { %p46_p8 = scmp.ne.s32.totalorder %s1980_s19, %s1976_s18  ;;  %p37_p1 = scmp.eq.s32.totalorder %s36_s12, 0 }
  0xa7   : > { %p47_p3 = scmp.eq.s32.totalorder %s1984_s20, 0  ;;  %p52_p11 = scmp.ne.s32.totalorder %s1976_s18, %s1972_s17 }
  0xa8   : > { %p291_p12 = scmp.eq.s32.totalorder %s2087_s23, 1  ;;  %p2547_p0 = scmp.eq.s32.totalorder %s2087_s23, 0 }
  0xa9   : > { %s2247_s30 = scalar_select %p37_p1, %s1980_s19, %s39_s2  }
  0xaa   : > { %p48_p13 = por %p47_p3, %p46_p8  ;;  %p2251_p2 = por %p2547_p0, %p52_p11 }
  0xab   : > { %2546 = sst [smem:[#allocation23_spill]] %s2247_s30  ;;  %p2255_p6 = por %p291_p12, %p46_p8 }
  0xac   : > { %p297_p5 = scmp.eq.s32.totalorder %s1373_s27, 1  ;;  %p1590_p7 = scmp.lt.s32.totalorder %s1984_s20, 2 }
  0xad   : > { %s2549_s21 = scalar_select %p2255_p6, 1, 0 }
  0xae   : > { %s394_s15 = sand.u32 1, %s1980_s19   ;;  %p2261_p9 = por %p297_p5, %p52_p11 }
  0xaf   : > { %s2265_s28 = sshll.u32 %s394_s15, 3  ;;  %s1439_s22 = sshll.u32 %s1984_s20, 7 }
  0xb0   : > { %s2550_s25 = scalar_select %p2261_p9, 1, 0 }
  0xb1   : > { %s2271_s14 = scalar_lea.hbm %s2506_s0, %s1439_s22  ;;  %s398_s29 = scalar_lea.vmem [#allocation3], %s2265_s28 }
  0xb2   : > { %s405_s27 = sshll.u32 %s398_s29, 4  ;;  %p2274_p4 = pnand %p1590_p7, %p48_p13  ;;  %s2278_s27 = int_to_ptr.vmem [resolvable:$true] %s405_s27 }
  0xb3   : > { %s2283_s10 = scalar_lea.hbm %s2507_s1, %s1439_s22  ;;  %s2285_s26 = scalar_lea.sflag [#allocation4], %s394_s15 }
  0xb4   : > { %s1842_s4 = scalar_lea.hbm %s2271_s14, 128  ;;  %p1844_p8 = pneg %p2274_p4 }
  0xb5   : > { %p1843_p10 = scmp.ne.s32.totalorder %s2271_s14, %s1842_s4  ;;  %s1847_s9 = scalar_lea.hbm %s2506_s0, 256 }
  0xb6   : > { %p1848_p11 = scmp.lt.u32.totalorder %s2271_s14, %s2506_s0  ;;  %p1849_p12 = scmp.lt.u32.totalorder %s1847_s9, %s1842_s4 }
  0xb7   : > { %p1845_p1 = pnand %p1844_p8, %p1843_p10  ;;  %p1851_p0 = scmp.lt.u32.totalorder %s1842_s4, %s2271_s14 }
  0xb8   : > { %p1850_p13 = por %p1849_p12, %p1848_p11 }
  0xb9   : > { %p1846_p3 = pneg %p1845_p1 }
  0xba   : > { %p1852_p5 = por %p1851_p0, %p1850_p13 }
  0xbc   : > { %p1853_p7 = pnand %p1852_p5, %p1846_p3 }
  0xbe   : > { %1856 = shalt.err (!%p1853_p7)
}
  0xbf   : > { %s1857_s3 = scalar_lea.vmem %s2278_s27, 128  ;;  %s1995_s6 = smov [#allocation3]  }
  0xc0   : > { %p1858_p10 = scmp.ne.s32.totalorder %s2278_s27, %s1857_s3  ;;  %s1862_s15 = sshll.u32 %s1995_s6, 4  ;;  %s1863_s15 = int_to_ptr.vmem [resolvable:$false] %s1862_s15 }
  0xc1   : > { %s1864_s19 = scalar_lea.vmem %s1863_s15, 256  ;;  %p1865_p6 = scmp.lt.s32.totalorder %s2278_s27, %s1863_s15 }
  0xc2   : > { %p1860_p1 = pnand %p1858_p10, %p1844_p8  ;;  %p1866_p11 = scmp.lt.s32.totalorder %s1864_s19, %s1857_s3 }
  0xc4   : > { %p1861_p9 = pneg %p1860_p1  ;;  %p1867_p12 = por %p1866_p11, %p1865_p6 }
  0xc6   : > { %p1868_p13 = pnand %p1867_p12, %p1861_p9 }
  0xc8   : > { %1871 = shalt.err (!%p1868_p13)
}
  0xc9   : > { %1577 = dma.hbm_to_vmem [thread:$0]  (!%p2274_p4), %s2271_s14, 128, %s2278_s27, %s2285_s26, %s2545_s8, %s2545_s8, %s2544_s11  }
  0xca   : > { %s419_s4 = scalar_lea.vmem [#allocation6], %s2265_s28  ;;  %s415_s30 = sand.u32 1, %s1984_s20  }
  0xcb   : > { %s426_s9 = sshll.u32 %s419_s4, 4  ;;  %s2320_s22 = scalar_lea.sflag [#allocation7], %s415_s30  ;;  %s2318_s9 = int_to_ptr.vmem [resolvable:$true] %s426_s9 }
  0xcc   : > { %s1872_s12 = scalar_lea.hbm %s2283_s10, 128  ;;  %s1877_s6 = scalar_lea.hbm %s2507_s1, 256 }
  0xcd   : > { %p1873_p6 = scmp.ne.s32.totalorder %s2283_s10, %s1872_s12  ;;  %p1878_p0 = scmp.lt.u32.totalorder %s2283_s10, %s2507_s1 }
  0xce   : > { %p1879_p5 = scmp.lt.u32.totalorder %s1877_s6, %s1872_s12  ;;  %p1881_p10 = scmp.lt.u32.totalorder %s1872_s12, %s2283_s10 }
  0xcf   : > { %p1875_p9 = pnand %p1873_p6, %p1844_p8 }
  0xd0   : > { %p1880_p7 = por %p1879_p5, %p1878_p0 }
  0xd1   : > { %p1876_p3 = pneg %p1875_p9 }
  0xd2   : > { %p1882_p1 = por %p1881_p10, %p1880_p7 }
  0xd4   : > { %p1883_p11 = pnand %p1882_p1, %p1876_p3 }
  0xd6   : > { %1886 = shalt.err (!%p1883_p11)
}
  0xd7   : > { %s1887_s28 = scalar_lea.vmem %s2318_s9, 128  ;;  %s1996_s14 = smov [#allocation6]  }
  0xd8   : > { %p1888_p12 = scmp.ne.s32.totalorder %s2318_s9, %s1887_s28  ;;  %s1892_s27 = sshll.u32 %s1996_s14, 4  ;;  %s1893_s27 = int_to_ptr.vmem [resolvable:$false] %s1892_s27 }
  0xd9   : > { %s1894_s26 = scalar_lea.vmem %s1893_s27, 256  ;;  %p1895_p9 = scmp.lt.s32.totalorder %s2318_s9, %s1893_s27 }
  0xda   : > { %p1890_p13 = pnand %p1888_p12, %p1844_p8  ;;  %p1896_p0 = scmp.lt.s32.totalorder %s1894_s26, %s1887_s28 }
  0xdc   : > { %p1891_p6 = pneg %p1890_p13  ;;  %p1897_p5 = por %p1896_p0, %p1895_p9 }
  0xde   : > { %p1898_p7 = pnand %p1897_p5, %p1891_p6 }
  0xe0   : > { %1901 = shalt.err (!%p1898_p7)
}
  0xe1   : > { %1580 = dma.hbm_to_vmem [thread:$0]  (!%p2274_p4), %s2283_s10, 128, %s2318_s9, %s2320_s22, %s2545_s8, %s2545_s8, %s2544_s11  }
  0xe2   : > { %p2552_p8 = scmp.ne.s32.totalorder %s2536_s24, 0 }
  0xe3   : > { %s2352_s4 = sand.u32 (!%p2552_p8), 1, %s1976_s18  }
  0xe4   : > { %438 = sbr.rel (%p2552_p8) target bundleno = 1857 (0x741), region = 64  ;;  %s1388_s30 = sshll.u32 (!%p2552_p8), %s2352_s4, 3 }
  0xe5   : > { %s441_s12 = scalar_lea.sflag (!%p2552_p8), [#allocation4], %s2352_s4  ;;  %s2356_s29 = scalar_lea.vmem (!%p2552_p8), [#allocation3], %s1388_s30 }
  0xeb   : > { %1947 = dma.done.wait (%p2251_p2), %s441_s12, 128  }
  0xec   : > { %1949 = vsyncadd (%p2251_p2), %s441_s12, 4294967168  ;;  %s449_s11 = sand.u32 1, %s2087_s23   ;;  %s2363_s8 = scalar_lea.vmem [#allocation6], %s1388_s30 }
  0xed   : > { %s450_s24 = scalar_lea.sflag [#allocation7], %s449_s11 }
  0xee   : > { %1951 = dma.done.wait (%p2251_p2), %s450_s24, 128  }
  0xef   : > { %1953 = vsyncadd (%p2251_p2), %s450_s24, 4294967168  ;;  %p2553_p4 = scmp.eq.s32.totalorder %s2087_s23, 0 }
  0xf1   : > { %1955 = dma.done.wait (%p2553_p4), [#allocation7], 1024   ;;  %p2554_p3 = pmov %p2553_p4 }
  0xf3   : > { %1957 = vsyncadd (%p2554_p3), [#allocation7], 4294966272  ;;  %p2555_p10 = pmov %p2554_p3 }
  0xf4   : > { %p2556_p1 = pmov %p2554_p3 }
  0xf5   : > { %1959 = dma.done.wait (%p2555_p10), [#allocation10], 1792  }
  0xf6   : > { %1961 = vsyncadd (%p2556_p1), [#allocation10], 4294965504  ;;  %p2557_p11 = pmov %p2556_p1 }
  0xf7   : > { %p2558_p12 = pmov %p2556_p1 }
  0xf8   : > { %1963 = dma.done.wait (%p2557_p11), [#allocation13], 1280  }
  0xf9   : > { %1965 = vsyncadd (%p2558_p12), [#allocation13], 4294966016  ;;  %v1997_v0 = vmov 0.0   ;;  %v1998_v1 = vmov 0   ;;  %vm1999_vm0 = vmmov 0   ;;  %v1646_v2 = vld [vmem:[#allocation8] sm:$0xff]  }
  0xfa   : > { %1468 = vmatprep.subr.bf16.mxu0 %v1997_v0  ;;  %746 = vmatprep.mubr.bf16.mxu1 %v1998_v1  ;;  %v1647_v3 = vld [vmem:[#allocation9 + $0x4] ss:$8 sps:$4 sm:$0xff]   ;;  %v1649_v4 = vld [vmem:[#allocation9] ss:$8 sps:$4 sm:$0xff]   ;;  %v1651_v6 = vld [vmem:[#allocation9 + $0x14] ss:$8 sps:$4 sm:$0xff]  }
  0xfb   : > { %1484 = vmatprep.mubr.msk.bf16.mxu0 %vm1999_vm0, %v1997_v0  ;;  %1469 = vmatpush3.bf16.msra.mxu0 %v1646_v2  ;;  %v1650_v5 = vld [vmem:[#allocation8 + $0x8] sm:$0xff]   ;;  %v1653_v7 = vld [vmem:[#allocation9 + $0x10] ss:$8 sps:$4 sm:$0xff]   ;;  %v1659_v11 = vld [vmem:[#allocation9 + $0x34] ss:$8 sps:$4 sm:$0xff]   ;;  %vm710_vm1 = vcmask 785408  }
  0xfc   : > { %714 = vmatprep.subr.bf16.mxu1 %v1647_v3  ;;  %1470 = vmatprep.subr.bf16.mxu0 %v1997_v0  ;;  %v1654_v8 = vld [vmem:[#allocation8 + $0x10] sm:$0xff]   ;;  %v1655_v9 = vld [vmem:[#allocation9 + $0x24] ss:$8 sps:$4 sm:$0xff]   ;;  %v1657_v10 = vld [vmem:[#allocation9 + $0x20] ss:$8 sps:$4 sm:$0xff]   ;;  %s2000_s13 = smov 1  }
  0xfd   : > { %715 = vmatpush1.bf16.msra.mxu1 %v1649_v4  ;;  %v1658_v12 = vld [vmem:[#allocation8 + $0x18] sm:$0xff]   ;;  %v1663_v14 = vld [vmem:[#allocation9 + $0x44] ss:$8 sps:$4 sm:$0xff]   ;;  %v1665_v16 = vld [vmem:[#allocation9 + $0x40] ss:$8 sps:$4 sm:$0xff]   ;;  %s2001_s2 = smov 127  }
  0xfe   : > { %716 = vmatprep.subr.bf16.mxu1 %v1651_v6  ;;  %v1661_v13 = vld [vmem:[#allocation9 + $0x30] ss:$8 sps:$4 sm:$0xff]   ;;  %v1662_v15 = vld [vmem:[#allocation8 + $0x20] sm:$0xff]   ;;  %v1666_v17 = vld [vmem:[#allocation8 + $0x28] sm:$0xff]   ;;  %vm802_vm2 = vcmask 523264   ;;  %s2002_s6 = smov 64  }
  0xff   : > { %1471 = vmatpush3.bf16.msra.mxu0 %v1650_v5  ;;  %v1667_v18 = vld [vmem:[#allocation9 + $0x54] ss:$8 sps:$4 sm:$0xff]   ;;  %v1669_v19 = vld [vmem:[#allocation9 + $0x50] ss:$8 sps:$4 sm:$0xff]   ;;  %v1673_v23 = vld [vmem:[%s2356_s29] sm:$0xff]   ;;  %vm850_vm3 = vcmask 130048  }
 0x100   : > { %1472 = vmatprep.subr.bf16.mxu0 %v1997_v0  ;;  %v1670_v20 = vld [vmem:[#allocation8 + $0x30] sm:$0xff]   ;;  %v1672_v22 = vld [vmem:[#allocation8 + $0x38] sm:$0xff]   ;;  %v757_v34 = vld [vmem:[#allocation11] sm:$0xff]  ;;  %vm1052_vm4 = vcmask 1048064   ;;  %s2559_s27 = sld [smem:[#allocation28_spill]]  ;;  %s1395_s26 = sshll.u32 %s2352_s4, 4 }
 0x101   : > { %717 = vmatpush1.bf16.msra.mxu1 %v1653_v7  ;;  %v1671_v21 = vld [vmem:[%s2363_s8] sm:$0xff]   ;;  %v758_v38 = vld [vmem:[#allocation11 + $0x8] sm:$0xff]  ;;  %s2560_s29 = sld [smem:[#allocation30_spill]]  ;;  %s516_s11 = scalar_lea.vmem [#allocation15], %s1395_s26 }
 0x102   : > { %718 = vmatprep.subr.bf16.mxu1 %v1655_v9  ;;  %v759_v33 = vld [vmem:[%s2511_s5] sm:$0xff]  ;;  %v760_v39 = vld [vmem:[%s2511_s5 + $0x8] sm:$0xff]  ;;  %s1230_s24 = sshll.u32 %s516_s11, 4  ;;  %s1441_s8 = sshll.u32 %s2087_s23, 8  ;;  %s2457_s24 = int_to_ptr.vmem [resolvable:$true] %s1230_s24 }
 0x103   : > { %1473 = vmatpush3.bf16.msra.mxu0 %v1654_v8  ;;  %v761_v41 = vld [vmem:[#allocation12] sm:$0xff]  ;;  %v762_v42 = vld [vmem:[#allocation12 + $0x8] sm:$0xff]  ;;  %s2561_s10 = sld [smem:[#allocation31_spill]]  ;;  %s1217_s22 = scalar_lea.sflag [#allocation5], %s2352_s4 }
 0x104   : > { %1474 = vmatprep.subr.bf16.mxu0 %v1997_v0  ;;  %s1902_s23 = scalar_lea.vmem %s2457_s24, 256  ;;  %p2562_p13 = scmp.ne.s32.totalorder %s2549_s21, 0 }
 0x105   : > { %719 = vmatpush1.bf16.msra.mxu1 %v1657_v10  ;;  %p1903_p2 = scmp.ne.s32.totalorder %s2457_s24, %s1902_s23  ;;  %s2003_s3 = smov [#allocation15]  }
 0x106   : > { %720 = vmatprep.subr.bf16.mxu1 %v1659_v11 }
 0x107   : > { %1475 = vmatpush3.bf16.msra.mxu0 %v1658_v12  ;;  %p1904_p6 = pnand %p1903_p2, %p2562_p13 }
 0x108   : > { %1476 = vmatprep.subr.bf16.mxu0 %v1997_v0 }
 0x109   : > { %721 = vmatpush1.bf16.msra.mxu1 %v1661_v13  ;;  %s2462_s9 = scalar_lea.hbm %s2561_s10, %s1441_s8  ;;  %p1905_p9 = pneg %p1904_p6 }
 0x10a   : > { %722 = vmatprep.subr.bf16.mxu1 %v1663_v14 }
 0x10b   : > { %1477 = vmatpush3.bf16.msra.mxu0 %v1662_v15 }
 0x10c   : > { %1478 = vmatprep.subr.bf16.mxu0 %v1997_v0 }
 0x10d   : > { %723 = vmatpush1.bf16.msra.mxu1 %v1665_v16 }
 0x10e   : > { %724 = vmatprep.subr.bf16.mxu1 %v1667_v18 }
 0x10f   : > { %1479 = vmatpush3.bf16.msra.mxu0 %v1666_v17 }
 0x110   : > { %1480 = vmatprep.subr.bf16.mxu0 %v1997_v0 }
 0x111   : > { %725 = vmatpush1.bf16.msra.mxu1 %v1669_v19 }
 0x112   : > { %1500 = vmatprep.subr.bf16.mxu1 %v1997_v0 }
 0x113   : > { %1481 = vmatpush3.bf16.msra.mxu0 %v1670_v20 }
 0x114   : > { %1418 = vmatmul.mubr.msk.bf16.vlgmr.msra.gmra.mrb[0].mxu1 %vm710_vm1, %v1671_v21  ;;  %1482 = vmatprep.subr.bf16.mxu0 %v1997_v0 }
 0x115   : > { %1502 = vmatprep.mubr.msk.bf16.mxu1 %vm1999_vm0, %v1997_v0 }
 0x117   : > { %1483 = vmatpush3.bf16.msra.mxu0 %v1672_v22 }
 0x118   : > { %1488 = vmatprep.subr.bf16.mxu0 %v1997_v0 }
 0x11a   : > { %1485 = vmatmul.mubr.bf16.vlgmr.msra.gmra.mrb[0].mxu0 %v1673_v23 }
 0x11b   : > { %1490 = vmatprep.mubr.msk.bf16.mxu0 %vm1999_vm0, %v1997_v0 }
 0x1e7   : > { %v748_v24 = vpop.f32.mrb[0].mxu1 }
 0x1e8   : > { %786 = vrot.lane.b32.xlu1 %v748_v24, %s2000_s13  ;;  %782 = vrot.lane.b32.xlu0 %v748_v24, %s2001_s2  ;;  %v750_v25 = vpop.f32.mrb[1].mxu1  ;;  %v790_v40 = vmul.f32 %v757_v34, %v748_v24 }
 0x1e9   : > { %v752_v26 = vpop.f32.mrb[2].mxu1 }
 0x1ea   : > { %v754_v27 = vpop.f32.mrb[3].mxu1  ;;  %v791_v45 = vmul.f32 %v758_v38, %v752_v26 }
 0x1eb   : > { %v2399_v28 = vpack.c.bf16 %v754_v27, %v750_v25 }
 0x1ec   : > { %788 = vrot.lane.b32.xlu1 %v752_v26, %s2000_s13  ;;  %784 = vrot.lane.b32.xlu0 %v752_v26, %s2001_s2 }
 0x1ed   : > { %v626_v29 = vpop.f32.mrb[0].mxu0 }
 0x1ee   : > { %v1486_v30 = vpop.f32.mrb[1].mxu0  ;;  %v771_v57 = vmul.f32 %v757_v34, %v626_v29 }
 0x1ef   : > { %v629_v31 = vpop.f32.mrb[2].mxu0 }
 0x1f0   : > { %763 = vrot.lane.b32.xlu0 %v626_v29, %s2001_s2  ;;  %765 = vrot.lane.b32.xlu1 %v629_v31, %s2001_s2  ;;  %v1487_v32 = vpop.f32.mrb[3].mxu0  ;;  %v772_v58 = vmul.f32 %v758_v38, %v629_v31 }
 0x1f4   : > { %767 = vrot.lane.b32.xlu0 %v626_v29, %s2000_s13  ;;  %769 = vrot.lane.b32.xlu1 %v629_v31, %s2000_s13 }
 0x25a   : > { %v787_v35 = vpop.permute.xlu1 %786  ;;  %v783_v36 = vpop.permute.xlu0 %782 }
 0x25b   : > { %v792_v37 = vmul.f32 %v783_v36, %v759_v33  ;;  %v796_v48 = vmul.f32 %v787_v35, %v761_v41 }
 0x25d   : > { %v794_v46 = vadd.f32 %v792_v37, %v790_v40 }
 0x25e   : > { %v789_v43 = vpop.permute.xlu1 %788  ;;  %v785_v44 = vpop.permute.xlu0 %784 }
 0x25f   : > { %v793_v47 = vmul.f32 %v785_v44, %v760_v39  ;;  %v797_v49 = vmul.f32 %v789_v43, %v762_v42  ;;  %v798_v53 = vadd.f32 %v796_v48, %v794_v46 }
 0x261   : > { %v795_v50 = vadd.f32 %v793_v47, %v791_v45 }
 0x262   : > { %v764_v51 = vpop.permute.xlu0 %763  ;;  %v766_v52 = vpop.permute.xlu1 %765 }
 0x263   : > { %v799_v54 = vadd.f32 %v797_v49, %v795_v50  ;;  %v773_v55 = vmul.f32 %v764_v51, %v759_v33  ;;  %v774_v56 = vmul.f32 %v766_v52, %v760_v39 }
 0x265   : > { %v800_v59 = vpack.c.bf16 %v799_v54, %v798_v53  ;;  %v775_v60 = vadd.f32 %v773_v55, %v771_v57  ;;  %v776_v63 = vadd.f32 %v774_v56, %v772_v58 }
 0x266   : > { %v768_v61 = vpop.permute.xlu0 %767  ;;  %v770_v62 = vpop.permute.xlu1 %769 }
 0x267   : > { %v777_v1 = vmul.f32 %v768_v61, %v761_v41  ;;  %924 = vrot.lane.b32.xlu0 %v800_v59, %s2002_s6  ;;  %v778_v2 = vmul.f32 %v770_v62, %v762_v42  ;;  %v807_v3 = vsel %vm802_vm2, %v800_v59, 0 }
 0x268   : > { %1489 = vmatpush3.bf16.xpose.msra.mxu0 %v807_v3 }
 0x269   : > { %v779_v4 = vadd.f32 %v777_v1, %v775_v60  ;;  %v780_v5 = vadd.f32 %v778_v2, %v776_v63  ;;  %1494 = vmatprep.subr.bf16.mxu0 %v1997_v0 }
 0x26b   : > { %v781_v6 = vpack.c.bf16 %v780_v5, %v779_v4 }
 0x26d   : > { %921 = vrot.lane.b32.xlu1 %v781_v6, %s2002_s6 }
 0x26f   : > { %1491 = vmatmul.mubr.msk.bf16.vlgmr.msra.gmra.mrb[4].mxu0 %vm802_vm2, %v781_v6 }
 0x270   : > { %1495 = vmatpush3.bf16.msra.mxu0 %v2399_v28  ;;  %1496 = vmatprep.mubr.msk.bf16.mxu0 %vm1999_vm0, %v1997_v0 }
 0x271   : > { %1506 = vmatprep.subr.bf16.mxu0 %v1997_v0 }
 0x2d9   : > { %v925_v7 = vpop.permute.xlu0 %924 }
 0x2da   : > { %v930_v8 = vsel %vm802_vm2, %v925_v7, 0 }
 0x2db   : > { %1501 = vmatpush3.bf16.xpose.msra.mxu1 %v930_v8  ;;  %v1674_v8 = vld [vmem:[#allocation14] sm:$0xff]  }
 0x2dc   : > { %1512 = vmatprep.subr.bf16.mxu1 %v1997_v0 }
 0x2df   : > { %v922_v9 = vpop.permute.xlu1 %921 }
 0x2e2   : > { %1503 = vmatmul.mubr.msk.bf16.vlgmr.msra.gmra.mrb[4].mxu1 %vm802_vm2, %v922_v9  ;;  %v1675_v9 = vld [vmem:[#allocation14 + $0x8] sm:$0xff]  }
 0x2e3   : > { %1528 = vmatprep.mubr.msk.bf16.mxu1 %vm1999_vm0, %v1997_v0  ;;  %1513 = vmatpush3.bf16.msra.mxu1 %v1674_v8 }
 0x2e4   : > { %1514 = vmatprep.subr.bf16.mxu1 %v1997_v0 }
 0x2e7   : > { %1515 = vmatpush3.bf16.msra.mxu1 %v1675_v9 }
 0x2e8   : > { %1516 = vmatprep.subr.bf16.mxu1 %v1997_v0 }
 0x342   : > { %v843_v10 = vpop.f32.mrb[4].mxu0 }
 0x343   : > { %v1492_v11 = vpop.f32.mrb[5].mxu0  ;;  %v851_v12 = vsel %vm850_vm3, %v843_v10, -inf }
 0x344   : > { %852 = vmax.xlane.f32.xlu0 %v851_v12  ;;  %v846_v13 = vpop.f32.mrb[6].mxu0  ;;  %v1677_v11 = vld [vmem:[#allocation14 + $0x18] sm:$0xff]   ;;  %v1678_v12 = vld [vmem:[#allocation14 + $0x20] sm:$0xff]  }
 0x345   : > { %v1493_v14 = vpop.f32.mrb[7].mxu0  ;;  %v854_v15 = vsel %vm850_vm3, %v846_v13, -inf }
 0x346   : > { %855 = vmax.xlane.f32.xlu1 %v854_v15  ;;  %v1680_v14 = vld [vmem:[#allocation14 + $0x30] sm:$0xff]   ;;  %v1681_v15 = vld [vmem:[#allocation14 + $0x38] sm:$0xff]  }
 0x357   : > { %995 = vrot.lane.b32.xlu1 %v2399_v28, %s2002_s6 }
 0x3b5   : > { %v966_v16 = vpop.f32.mrb[4].mxu1 }
 0x3b6   : > { %v1504_v17 = vpop.f32.mrb[5].mxu1  ;;  %v973_v18 = vsel %vm850_vm3, %v966_v16, -inf }
 0x3b7   : > { %v969_v19 = vpop.f32.mrb[6].mxu1  ;;  %974 = vmax.xlane.f32.xlu0 %v973_v18 }
 0x3b8   : > { %v1505_v20 = vpop.f32.mrb[7].mxu1  ;;  %v976_v21 = vsel %vm850_vm3, %v969_v19, -inf }
 0x3bb   : > { %977 = vmax.xlane.f32.xlu0 %v976_v21 }
 0x3d1   : > { %v853_v22 = vpop.xlane.xlu0 %852 }
 0x3d2   : > { %v857_v23 = vsub.f32 %v843_v10, %v853_v22  ;;  %v1676_v10 = vld [vmem:[#allocation14 + $0x10] sm:$0xff]  }
 0x3d3   : > { %v856_v24 = vpop.xlane.xlu1 %855  ;;  %1517 = vmatpush3.bf16.msra.mxu1 %v1676_v10 }
 0x3d4   : > { %v859_v25 = vmul.f32 1.442695, %v857_v23  ;;  %v858_v26 = vsub.f32 %v846_v13, %v856_v24  ;;  %1518 = vmatprep.subr.bf16.mxu1 %v1997_v0  ;;  %v1679_v13 = vld [vmem:[#allocation14 + $0x28] sm:$0xff]  }
 0x3d6   : > { %v861_v27 = vmul.f32 1.442695, %v858_v26  ;;  %1682 = vpow2.f32 %v859_v25 }
 0x3d7   : > { %v996_v31 = vpop.permute.xlu1 %995  ;;  %1519 = vmatpush3.bf16.msra.mxu1 %v1677_v11 }
 0x3d8   : > { %1684 = vpow2.f32 %v861_v27  ;;  %1520 = vmatprep.subr.bf16.mxu1 %v1997_v0 }
 0x3db   : > { %1521 = vmatpush3.bf16.msra.mxu1 %v1678_v12 }
 0x3dc   : > { %1522 = vmatprep.subr.bf16.mxu1 %v1997_v0 }
 0x3df   : > { %1523 = vmatpush3.bf16.msra.mxu1 %v1679_v13 }
 0x3e0   : > { %v1683_v29 = vpop.eup %1682  ;;  %1524 = vmatprep.subr.bf16.mxu1 %v1997_v0 }
 0x3e1   : > { %v863_v43 = vsel %vm850_vm3, %v1683_v29, 0.0 }
 0x3e2   : > { %v1685_v28 = vpop.eup %1684 }
 0x3e3   : > { %v871_v30 = vpack.c.bf16 %v1685_v28, %v1683_v29  ;;  %v866_v44 = vsel %vm850_vm3, %v1685_v28, 0.0  ;;  %1525 = vmatpush3.bf16.msra.mxu1 %v1680_v14 }
 0x3e4   : > { %1526 = vmatprep.subr.bf16.mxu1 %v1997_v0 }
 0x3e5   : > { %1497 = vmatmul.mubr.msk.bf16.vlgmr.msra.gmra.mrb[8].mxu0 %vm850_vm3, %v871_v30 }
 0x3e6   : > { %1507 = vmatpush3.bf16.msra.mxu0 %v996_v31  ;;  %1508 = vmatprep.mubr.msk.bf16.mxu0 %vm1999_vm0, %v1997_v0 }
 0x3e7   : > { %1527 = vmatpush3.bf16.msra.mxu1 %v1681_v15 }
 0x444   : > { %v975_v32 = vpop.xlane.xlu0 %974 }
 0x445   : > { %v979_v33 = vsub.f32 %v966_v16, %v975_v32  ;;  %v1423_v32 = vld [vmem:[%s2513_s7] ss:$0 sm:$0xff] }
 0x447   : > { %v981_v34 = vmul.f32 1.442695, %v979_v33 }
 0x448   : > { %v978_v35 = vpop.xlane.xlu0 %977 }
 0x449   : > { %1686 = vpow2.f32 %v981_v34  ;;  %v980_v36 = vsub.f32 %v969_v19, %v978_v35 }
 0x44b   : > { %v983_v37 = vmul.f32 1.442695, %v980_v36 }
 0x44d   : > { %1688 = vpow2.f32 %v983_v37  ;;  %v1424_v37 = vld [vmem:[%s2559_s27] ss:$0 sm:$0xff] }
 0x453   : > { %v1687_v38 = vpop.eup %1686 }
 0x454   : > { %v985_v39 = vsel %vm850_vm3, %v1687_v38, 0.0 }
 0x455   : > { %986 = vadd.xlane.f32.xlu0 %v985_v39 }
 0x457   : > { %v1689_v40 = vpop.eup %1688 }
 0x458   : > { %v988_v41 = vsel %vm850_vm3, %v1689_v40, 0.0  ;;  %v993_v42 = vpack.c.bf16 %v1689_v40, %v1687_v38 }
 0x459   : > { %989 = vadd.xlane.f32.xlu0 %v988_v41 }
 0x45a   : > { %1509 = vmatmul.mubr.msk.bf16.vlgmr.msra.gmra.mrb[12].mxu0 %vm850_vm3, %v993_v42  ;;  %v1425_v42 = vld [vmem:[%s2560_s29] ss:$0 sm:$0xff] }
 0x45d   : > { %864 = vadd.xlane.f32.xlu0 %v863_v43 }
 0x461   : > { %867 = vadd.xlane.f32.xlu0 %v866_v44 }
 0x4b8   : > { %v909_v45 = vpop.f32.mrb[8].mxu0 }
 0x4b9   : > { %v1498_v46 = vpop.f32.mrb[9].mxu0 }
 0x4ba   : > { %v912_v47 = vpop.f32.mrb[10].mxu0 }
 0x4bb   : > { %v1499_v48 = vpop.f32.mrb[11].mxu0 }
 0x4e2   : > { %v987_v49 = vpop.xlane.xlu0 %986 }
 0x4e6   : > { %v990_v50 = vpop.xlane.xlu0 %989 }
 0x4ea   : > { %v865_v51 = vpop.xlane.xlu0 %864 }
 0x4eb   : > { %1690 = vrcp.f32 %v865_v51 }
 0x4ee   : > { %v868_v52 = vpop.xlane.xlu0 %867 }
 0x4ef   : > { %1692 = vrcp.f32 %v868_v52 }
 0x4f0   : > { %1694 = vrcp.f32 %v987_v49 }
 0x4f1   : > { %1696 = vrcp.f32 %v990_v50 }
 0x4f5   : > { %v1691_v53 = vpop.eup %1690 }
 0x4f6   : > { %v916_v54 = vmul.f32 %v1691_v53, %v909_v45 }
 0x4f8   : > { %918 = vst.msk [vmem:[#allocation2] sm:$0xff] %vm802_vm2, %v916_v54 }
 0x4f9   : > { %v1693_v55 = vpop.eup %1692 }
 0x4fa   : > { %v917_v56 = vmul.f32 %v1693_v55, %v912_v47  ;;  %v1695_v57 = vpop.eup %1694 }
 0x4fb   : > { %v1697_v61 = vpop.eup %1696 }
 0x4fc   : > { %919 = vst.msk [vmem:[#allocation2 + $0x8] sm:$0xff] %vm802_vm2, %v917_v56 }
 0x52d   : > { %v1035_v58 = vpop.f32.mrb[12].mxu0 }
 0x52e   : > { %v1042_v59 = vmul.f32 %v1695_v57, %v1035_v58  ;;  %v1510_v60 = vpop.f32.mrb[13].mxu0 }
 0x52f   : > { %v1038_v62 = vpop.f32.mrb[14].mxu0 }
 0x530   : > { %v1043_v63 = vmul.f32 %v1697_v61, %v1038_v62  ;;  %1046 = vrot.lane.b32.xlu1 %v1042_v59, %s2002_s6  ;;  %v1511_v1 = vpop.f32.mrb[15].mxu0 }
 0x532   : > { %1048 = vrot.lane.b32.xlu0 %v1043_v63, %s2002_s6  ;;  %s1906_s6 = sshll.u32 %s2003_s3, 4  ;;  %s1907_s6 = int_to_ptr.vmem [resolvable:$false] %s1906_s6 }
 0x533   : > { %s1908_s15 = scalar_lea.vmem %s1907_s6, 512  ;;  %p1909_p0 = scmp.lt.s32.totalorder %s2457_s24, %s1907_s6 }
 0x534   : > { %p1910_p5 = scmp.lt.s32.totalorder %s1908_s15, %s1902_s23 }
 0x536   : > { %p1911_p7 = por %p1910_p5, %p1909_p0 }
 0x538   : > { %p1912_p8 = pnand %p1911_p7, %p1905_p9 }
 0x5a2   : > { %v1047_v2 = vpop.permute.xlu1 %1046 }
 0x5a3   : > { %1053 = vst.msk [vmem:[#allocation2] sm:$0xff] %vm1052_vm4, %v1047_v2 }
 0x5a4   : > { %v1049_v3 = vpop.permute.xlu0 %1048 }
 0x5a5   : > { %1054 = vst.msk [vmem:[#allocation2 + $0x8] sm:$0xff] %vm1052_vm4, %v1049_v3 }
 0x5aa   : > { %v1055_v4 = vld [vmem:[#allocation2] sm:$0xff] }
 0x5ab   : > { %1057 = vadd.xlane.f32.xlu1 %v1055_v4  ;;  %v1061_v6 = vmul.f32 %v1055_v4, %v1055_v4 }
 0x5ac   : > { %v1056_v5 = vld [vmem:[#allocation2 + $0x8] sm:$0xff] }
 0x5ad   : > { %1059 = vadd.xlane.f32.xlu0 %v1056_v5  ;;  %v1062_v7 = vmul.f32 %v1056_v5, %v1056_v5 }
 0x5af   : > { %1063 = vadd.xlane.f32.xlu1 %v1061_v6 }
 0x5b3   : > { %1065 = vadd.xlane.f32.xlu1 %v1062_v7 }
 0x638   : > { %v1058_v16 = vpop.xlane.xlu1 %1057 }
 0x639   : > { %v1067_v17 = vmul.f32 0.0078125, %v1058_v16 }
 0x63a   : > { %v1060_v18 = vpop.xlane.xlu0 %1059 }
 0x63b   : > { %v1071_v20 = vmul.f32 %v1067_v17, %v1067_v17  ;;  %v1068_v21 = vmul.f32 0.0078125, %v1060_v18  ;;  %v1075_v30 = vsub.f32 %v1055_v4, %v1067_v17 }
 0x63c   : > { %v1064_v19 = vpop.xlane.xlu1 %1063 }
 0x63d   : > { %v1069_v22 = vmul.f32 0.0078125, %v1064_v19  ;;  %v1072_v25 = vmul.f32 %v1068_v21, %v1068_v21  ;;  %v1076_v33 = vsub.f32 %v1056_v5, %v1068_v21 }
 0x63f   : > { %v1073_v23 = vsub.f32 %v1069_v22, %v1071_v20 }
 0x640   : > { %v1066_v24 = vpop.xlane.xlu1 %1065 }
 0x641   : > { %v1077_v26 = vadd.f32 1e-05, %v1073_v23  ;;  %v1070_v27 = vmul.f32 0.0078125, %v1066_v24 }
 0x643   : > { %1698 = vrsqrt.f32 %v1077_v26  ;;  %v1074_v29 = vsub.f32 %v1070_v27, %v1072_v25 }
 0x645   : > { %v1078_v28 = vadd.f32 1e-05, %v1074_v29 }
 0x647   : > { %1700 = vrsqrt.f32 %v1078_v28 }
 0x64d   : > { %v1699_v0 = vpop.eup %1698 }
 0x64e   : > { %v1081_v31 = vmul.f32 %v1699_v0, %v1075_v30 }
 0x650   : > { %v1090_v36 = vmul.f32 %v1423_v32, %v1081_v31 }
 0x651   : > { %v1701_v34 = vpop.eup %1700 }
 0x652   : > { %v1082_v35 = vmul.f32 %v1701_v34, %v1076_v33  ;;  %v1099_v39 = vadd.f32 %v1424_v37, %v1090_v36 }
 0x654   : > { %v1091_v38 = vmul.f32 %v1423_v32, %v1082_v35 }
 0x656   : > { %v1100_v40 = vadd.f32 %v1424_v37, %v1091_v38 }
 0x658   : > { %v1101_v41 = vpack.c.bf16 %v1100_v40, %v1099_v39 }
 0x65a   : > { %1529 = vmatmul.mubr.bf16.vlgmr.msra.gmra.mrb[8].mxu1 %v1101_v41 }
 0x72d   : > { %v1207_v43 = vpop.f32.mrb[8].mxu1 }
 0x72e   : > { %v1208_v44 = vadd.f32 %v1425_v42, %v1207_v43  ;;  %v1530_v45 = vpop.f32.mrb[9].mxu1 }
 0x72f   : > { %v1210_v46 = vpop.f32.mrb[10].mxu1 }
 0x730   : > { %1214 = vst [vmem:[%s516_s11] sm:$0xff] %v1208_v44  ;;  %v1211_v47 = vadd.f32 %v1425_v42, %v1210_v46  ;;  %v1531_v48 = vpop.f32.mrb[11].mxu1 }
 0x732   : > { %1215 = vst [vmem:[%s516_s11 + $0x8] sm:$0xff] %v1211_v47 }
 0x733   : > { %1915 = shalt.err (!%p1912_p8)
}
 0x734   : > { %s1916_s19 = scalar_lea.hbm %s2462_s9, 256  ;;  %s1920_s27 = scalar_lea.hbm %s2561_s10, 512 }
 0x735   : > { %p1917_p4 = scmp.ne.s32.totalorder %s2462_s9, %s1916_s19  ;;  %p1921_p1 = scmp.lt.u32.totalorder %s2462_s9, %s2561_s10 }
 0x736   : > { %p1922_p11 = scmp.lt.u32.totalorder %s1920_s27, %s1916_s19  ;;  %p1924_p2 = scmp.lt.u32.totalorder %s1916_s19, %s2462_s9 }
 0x737   : > { %p1918_p3 = pnand %p1917_p4, %p2562_p13 }
 0x738   : > { %p1923_p12 = por %p1922_p11, %p1921_p1 }
 0x739   : > { %p1919_p10 = pneg %p1918_p3 }
 0x73a   : > { %p1925_p6 = por %p1924_p2, %p1923_p12 }
 0x73c   : > { %p1926_p9 = pnand %p1925_p6, %p1919_p10 }
 0x73e   : > { %1929 = shalt.err (!%p1926_p9)
}
 0x73f   : > { %s2004_s12 = smov 128   ;;  %s2005_s29 = smov 8  }
 0x740   : > { %1556 = dma.vmem_to_hbm [thread:$0]  (%p2562_p13), %s2457_s24, 256, %s2462_s9, %s1217_s22, %s2004_s12, %s2004_s12, %s2005_s29  }
 0x741 PF: > { %s1245_s11 = sand.u32 1, %s1972_s17   ;;  %p2563_p0 = scmp.ne.s32.totalorder %s2550_s25, 0 }
 0x742   : > { %p2564_p5 = scmp.ge.s32.totalorder %s1984_s20, 2  ;;  %s1246_s8 = scalar_lea.sflag [#allocation5], %s1245_s11 }
 0x744   : > { %p1582_p7 = pnand %p2564_p5, %p2563_p0 }
 0x746   : > { %1967 = dma.done.wait (!%p1582_p7), %s1246_s8, 256  }
 0x747   : > { %1969 = vsyncadd (!%p1582_p7), %s1246_s8, 4294967040  ;;  %s2565_s13 = sld [smem:[#allocation22_spill]]  ;;  %s2566_s19 = sld [smem:[#allocation23_spill]] }
 0x748   : > { %p29_p8 = scmp.ge.s32.totalorder %s2235_s16, 4   ;;  %s2567_s17 = smov %s1976_s18 }
 0x749   : > { %s2569_s20 = smov %s2235_s16 }
 0x74a   :  { %31 = sbr.rel (!%p29_p8) target bundleno = 18 (0x12), region = 142 }
 0x74d   : > { %s2568_s18 = smov %s2565_s13 }
 0x751   :  { %1251 = vsyncpa [#allocation4], 1 }
 0x752   :  { %1253 = vsyncpa [#allocation4 + $0x1], 1 }
 0x753   :  { %1254 = vsyncpa [#allocation7], 1 }
 0x754   :  { %1256 = vsyncpa [#allocation7 + $0x1], 1 }
 0x755   :  { %1257 = vsyncpa [#allocation10], 1 }
 0x756   :  { %1258 = vsyncpa [#allocation13], 1 }
 0x757   :  { %1259 = vsyncpa [#allocation5], 1 }
 0x758   :  { %1261 = vsyncpa [#allocation5 + $0x1], 1 }

</bundles_post_ra>
